<compile_context>
chip_gen: v6e
topology: v6e:2x2x1
jax: 0.10.0
libtpu: 0.0.40
codegen_flags: <defaults>
</compile_context>

<pallas_src>
import jax
import jax.numpy as jnp
from jax.experimental import pallas as pl
from jax.experimental.pallas import tpu as pltpu  # noqa: F401  (kept for future tiling / compiler params)

# ---- problem sizes (small, consistent with the module) ----
B, N, C = 2, 8, 32          # batch, sequence length, embedding dim
H = 4                       # num_heads
D = C // H                  # head_dim
MLP_RATIO = 4.0
HID = int(C * MLP_RATIO)    # mlp hidden dim = 128
SCALE = D ** (-0.5)         # qk_scale default
EPS = 1e-5                  # nn.LayerNorm default eps

# row indices inside the packed (8, C) vector table
ROW_N1W, ROW_N1B, ROW_PB, ROW_N2W, ROW_N2B, ROW_B2 = range(6)


def _layernorm(x, w, b):
    mu = jnp.mean(x, axis=-1, keepdims=True)
    var = jnp.mean((x - mu) ** 2, axis=-1, keepdims=True)
    return (x - mu) * jax.lax.rsqrt(var + EPS) * w + b


def _gelu_tanh(x):
    c0 = jnp.float32(jnp.sqrt(2.0 / jnp.pi))
    return 0.5 * x * (1.0 + jnp.tanh(c0 * (x + 0.044715 * x ** 3)))


def transform_block_kernel(
    x_ref,       # (B*N, C)  flattened tokens
    vec_ref,     # (8, C)    packed rows: n1w, n1b, proj_bias, n2w, n2b, fc2_bias, pad, pad
    b1_ref,      # (1, HID)  fc1 bias
    wqkv_ref,    # (C, 3C)   fused [q | k | v] weights (pre-transposed: in x out)
    wp_ref,      # (C, C)    attn proj weight (pre-transposed)
    w1_ref,      # (C, HID)  fc1 weight (pre-transposed)
    w2_ref,      # (HID, C)  fc2 weight (pre-transposed)
    o_ref,       # (B*N, C)
):
    x = x_ref[...]                                                        # (B*N, C) f32

    # ---- attention branch ----
    xn = _layernorm(x, vec_ref[ROW_N1W:ROW_N1W + 1, :], vec_ref[ROW_N1B:ROW_N1B + 1, :])
    qkv = jnp.dot(xn, wqkv_ref[...], preferred_element_type=jnp.float32)  # (B*N, 3C)
    q = qkv[:, :C]
    k = qkv[:, C:2 * C]
    v = qkv[:, 2 * C:]

    # per-(batch, head) attention with the output projection folded into the loop
    # (static slices only; no lane concat of head outputs).
    ao_rows = []
    for b in range(B):
        rs = slice(b * N, (b + 1) * N)
        acc_b = jnp.zeros((N, C), jnp.float32)
        for h in range(H):
            cs = slice(h * D, (h + 1) * D)
            qh, kh, vh = q[rs, cs], k[rs, cs], v[rs, cs]
            attn = jnp.dot(qh, kh.T, preferred_element_type=jnp.float32) * SCALE   # (N, N)
            attn = attn - jnp.max(attn, axis=-1, keepdims=True)
            attn = jnp.exp(attn)
            attn = attn * pl.reciprocal(jnp.sum(attn, axis=-1, keepdims=True), approx=True)
            oh = jnp.dot(attn, vh, preferred_element_type=jnp.float32)             # (N, D)
            acc_b = acc_b + jnp.dot(oh, wp_ref[cs, :], preferred_element_type=jnp.float32)
        ao_rows.append(acc_b)
    ao = jnp.concatenate(ao_rows, axis=0) + vec_ref[ROW_PB:ROW_PB + 1, :]          # (B*N, C)

    x1 = x + ao                                                                     # residual 1

    # ---- mlp branch ----
    xn2 = _layernorm(x1, vec_ref[ROW_N2W:ROW_N2W + 1, :], vec_ref[ROW_N2B:ROW_N2B + 1, :])
    hdn = jnp.dot(xn2, w1_ref[...], preferred_element_type=jnp.float32) + b1_ref[...]
    hdn = _gelu_tanh(hdn)
    mo = jnp.dot(hdn, w2_ref[...], preferred_element_type=jnp.float32) + vec_ref[ROW_B2:ROW_B2 + 1, :]

    o_ref[...] = (x1 + mo).astype(o_ref.dtype)                                      # residual 2


def transform_block(x, params):
    n1w, n1b, wqt, wkvt, wpt, pb, n2w, n2b, w1t, b1, w2t, b2 = params

    # fuse q + kv weights -> (C, 3C); pack the seven (1,*) vectors into two refs
    wqkv = jnp.concatenate([wqt, wkvt], axis=1)                          # (C, 3C)
    vec = jnp.concatenate(
        [n1w, n1b, pb, n2w, n2b, b2, jnp.zeros((2, C), jnp.float32)], axis=0)  # (8, C)

    x_flat = x.reshape(B * N, C)                                         # free HBM reshape

    out = pl.pallas_call(
        transform_block_kernel,
        out_shape=jax.ShapeDtypeStruct((B * N, C), jnp.float32),
        # no grid: the whole problem fits in VMEM, one kernel step, whole-array refs
    )(x_flat, vec, b1, wqkv, wpt, w1t, w2t)
    return out.reshape(B, N, C)


def reference(x, params):
    """Pure-JAX mirror of the PyTorch TransformBlock forward (for correctness check)."""
    n1w, n1b, wqt, wkvt, wpt, pb, n2w, n2b, w1t, b1, w2t, b2 = params

    def ln(z, w, b):
        mu = z.mean(-1, keepdims=True)
        var = ((z - mu) ** 2).mean(-1, keepdims=True)
        return (z - mu) / jnp.sqrt(var + EPS) * w + b

    xn = ln(x, n1w[0], n1b[0])
    q = xn @ wqt
    kv = xn @ wkvt
    k, v = kv[..., :C], kv[..., C:]
    qh = q.reshape(B, N, H, D).transpose(0, 2, 1, 3)
    kh = k.reshape(B, N, H, D).transpose(0, 2, 1, 3)
    vh = v.reshape(B, N, H, D).transpose(0, 2, 1, 3)
    attn = jnp.einsum('bhnd,bhmd->bhnm', qh, kh) * SCALE
    attn = jax.nn.softmax(attn, axis=-1)
    ao = jnp.einsum('bhnm,bhmd->bhnd', attn, vh).transpose(0, 2, 1, 3).reshape(B, N, C)
    ao = ao @ wpt + pb[0]
    x1 = x + ao
    xn2 = ln(x1, n2w[0], n2b[0])
    hdn = xn2 @ w1t + b1[0]
    hdn = _gelu_tanh(hdn)
    return x1 + (hdn @ w2t + b2[0])


def make_params(key):
    ks = jax.random.split(key, 8)
    f32 = jnp.float32
    n1w = jnp.ones((1, C), f32)
    n1b = jnp.zeros((1, C), f32)
    wqt = 0.02 * jax.random.normal(ks[0], (C, C), f32)       # q weight^T  (in, out)
    wkvt = 0.02 * jax.random.normal(ks[1], (C, 2 * C), f32)  # kv weight^T (k cols first, then v)
    wpt = 0.02 * jax.random.normal(ks[2], (C, C), f32)       # proj weight^T
    pb = 0.02 * jax.random.normal(ks[3], (1, C), f32)        # proj bias
    n2w = jnp.ones((1, C), f32)
    n2b = jnp.zeros((1, C), f32)
    w1t = 0.02 * jax.random.normal(ks[4], (C, HID), f32)     # fc1 weight^T
    b1 = 0.02 * jax.random.normal(ks[5], (1, HID), f32)
    w2t = 0.02 * jax.random.normal(ks[6], (HID, C), f32)     # fc2 weight^T
    b2 = 0.02 * jax.random.normal(ks[7], (1, C), f32)
    return [n1w, n1b, wqt, wkvt, wpt, pb, n2w, n2b, w1t, b1, w2t, b2]


if __name__ == "__main__":
    key = jax.random.PRNGKey(0)
    kx, kp = jax.random.split(key)
    x = jax.random.normal(kx, (B, N, C), jnp.float32)
    params = make_params(kp)

    out = jax.block_until_ready(transform_block(x, params))
    ref = jax.block_until_ready(reference(x, params))

    assert out.shape == (B, N, C)
    # approx=True softmax reciprocal -> allow slightly looser tolerance
    assert jnp.allclose(out, ref, rtol=1e-3, atol=1e-3), float(jnp.max(jnp.abs(out - ref)))

    print("KERNEL_OK")
</pallas_src>

<mosaic_0001>
module attributes {stable_mosaic.version = 11 : i64} {
  func.func @transform_block_kernel(%arg0: memref<16x32xf32, #tpu.memory_space<vmem>>, %arg1: memref<8x32xf32, #tpu.memory_space<vmem>>, %arg2: memref<1x128xf32, #tpu.memory_space<vmem>>, %arg3: memref<32x96xf32, #tpu.memory_space<vmem>>, %arg4: memref<32x32xf32, #tpu.memory_space<vmem>>, %arg5: memref<32x128xf32, #tpu.memory_space<vmem>>, %arg6: memref<128x32xf32, #tpu.memory_space<vmem>>, %arg7: memref<16x32xf32, #tpu.memory_space<vmem>>) attributes {dimension_semantics = [], scalar_prefetch = 0 : i64, scratch_operands = 0 : i64, tpu.core_type = #tpu.core_type<tc>} {
    %c0 = arith.constant 0 : index
    %c0_0 = arith.constant 0 : index
    %0 = vector.load %arg0[%c0, %c0_0] : memref<16x32xf32, #tpu.memory_space<vmem>>, vector<16x32xf32>
    %c0_1 = arith.constant 0 : index
    %c0_2 = arith.constant 0 : index
    %1 = vector.load %arg1[%c0_1, %c0_2] : memref<8x32xf32, #tpu.memory_space<vmem>>, vector<1x32xf32>
    %c1 = arith.constant 1 : index
    %c0_3 = arith.constant 0 : index
    %2 = vector.load %arg1[%c1, %c0_3] : memref<8x32xf32, #tpu.memory_space<vmem>>, vector<1x32xf32>
    %cst = arith.constant dense<0.000000e+00> : vector<16xf32>
    %3 = vector.multi_reduction <add>, %0, %cst [1] : vector<16x32xf32> to vector<16xf32>
    %4 = vector.shape_cast %3 : vector<16xf32> to vector<16x1xf32>
    %cst_4 = arith.constant 3.200000e+01 : f32
    %5 = vector.broadcast %cst_4 : f32 to vector<16x1xf32>
    %6 = arith.divf %4, %5 : vector<16x1xf32>
    %7 = vector.broadcast %6 : vector<16x1xf32> to vector<16x32xf32>
    %8 = arith.subf %0, %7 : vector<16x32xf32>
    %9 = arith.mulf %8, %8 : vector<16x32xf32>
    %cst_5 = arith.constant dense<0.000000e+00> : vector<16xf32>
    %10 = vector.multi_reduction <add>, %9, %cst_5 [1] : vector<16x32xf32> to vector<16xf32>
    %11 = vector.shape_cast %10 : vector<16xf32> to vector<16x1xf32>
    %cst_6 = arith.constant 3.200000e+01 : f32
    %12 = vector.broadcast %cst_6 : f32 to vector<16x1xf32>
    %13 = arith.divf %11, %12 : vector<16x1xf32>
    %14 = vector.broadcast %6 : vector<16x1xf32> to vector<16x32xf32>
    %15 = arith.subf %0, %14 : vector<16x32xf32>
    %cst_7 = arith.constant 9.99999974E-6 : f32
    %16 = vector.broadcast %cst_7 : f32 to vector<16x1xf32>
    %17 = arith.addf %13, %16 : vector<16x1xf32>
    %18 = math.rsqrt %17 : vector<16x1xf32>
    %19 = vector.broadcast %18 : vector<16x1xf32> to vector<16x32xf32>
    %20 = arith.mulf %15, %19 : vector<16x32xf32>
    %21 = vector.broadcast %1 : vector<1x32xf32> to vector<16x32xf32>
    %22 = arith.mulf %20, %21 : vector<16x32xf32>
    %23 = vector.broadcast %2 : vector<1x32xf32> to vector<16x32xf32>
    %24 = arith.addf %22, %23 : vector<16x32xf32>
    %c0_8 = arith.constant 0 : index
    %c0_9 = arith.constant 0 : index
    %25 = vector.load %arg3[%c0_8, %c0_9] : memref<32x96xf32, #tpu.memory_space<vmem>>, vector<32x96xf32>
    %cst_10 = arith.constant dense<0.000000e+00> : vector<16x96xf32>
    %26 = tpu.matmul %24, %25, %cst_10 {dimension_numbers = #tpu.dot_dimension_numbers<[1], [0], [0], [1], [0, 0, 1, 1], [], []>} : vector<16x32xf32>, vector<32x96xf32>, vector<16x96xf32> -> vector<16x96xf32>
    %27 = vector.extract_strided_slice %26 {offsets = [0, 0], sizes = [16, 32], strides = [1, 1]} : vector<16x96xf32> to vector<16x32xf32>
    %28 = vector.extract_strided_slice %26 {offsets = [0, 32], sizes = [16, 32], strides = [1, 1]} : vector<16x96xf32> to vector<16x32xf32>
    %29 = vector.extract_strided_slice %26 {offsets = [0, 64], sizes = [16, 32], strides = [1, 1]} : vector<16x96xf32> to vector<16x32xf32>
    %cst_11 = arith.constant 0.000000e+00 : f32
    %30 = vector.broadcast %cst_11 : f32 to vector<8x32xf32>
    %31 = vector.extract_strided_slice %27 {offsets = [0, 0], sizes = [8, 8], strides = [1, 1]} : vector<16x32xf32> to vector<8x8xf32>
    %32 = vector.extract_strided_slice %28 {offsets = [0, 0], sizes = [8, 8], strides = [1, 1]} : vector<16x32xf32> to vector<8x8xf32>
    %33 = vector.extract_strided_slice %29 {offsets = [0, 0], sizes = [8, 8], strides = [1, 1]} : vector<16x32xf32> to vector<8x8xf32>
    %34 = tpu.transpose %32, [1, 0] : vector<8x8xf32> -> vector<8x8xf32>
    %cst_12 = arith.constant dense<0.000000e+00> : vector<8x8xf32>
    %35 = tpu.matmul %31, %34, %cst_12 {dimension_numbers = #tpu.dot_dimension_numbers<[1], [0], [0], [1], [0, 0, 1, 1], [], []>} : vector<8x8xf32>, vector<8x8xf32>, vector<8x8xf32> -> vector<8x8xf32>
    %cst_13 = arith.constant 0.353553385 : f32
    %36 = vector.broadcast %cst_13 : f32 to vector<8x8xf32>
    %37 = arith.mulf %35, %36 : vector<8x8xf32>
    %cst_14 = arith.constant dense<0xFF800000> : vector<8xf32>
    %38 = vector.multi_reduction <maximumf>, %37, %cst_14 [1] : vector<8x8xf32> to vector<8xf32>
    %39 = vector.shape_cast %38 : vector<8xf32> to vector<8x1xf32>
    %40 = vector.broadcast %39 : vector<8x1xf32> to vector<8x8xf32>
    %41 = arith.subf %37, %40 : vector<8x8xf32>
    %42 = math.exp %41 : vector<8x8xf32>
    %cst_15 = arith.constant dense<0.000000e+00> : vector<8xf32>
    %43 = vector.multi_reduction <add>, %42, %cst_15 [1] : vector<8x8xf32> to vector<8xf32>
    %44 = vector.shape_cast %43 : vector<8xf32> to vector<8x1xf32>
    %45 = tpu.reciprocal %44 {approx = true} : vector<8x1xf32> -> vector<8x1xf32>
    %46 = vector.broadcast %45 : vector<8x1xf32> to vector<8x8xf32>
    %47 = arith.mulf %42, %46 : vector<8x8xf32>
    %cst_16 = arith.constant dense<0.000000e+00> : vector<8x8xf32>
    %48 = tpu.matmul %47, %33, %cst_16 {dimension_numbers = #tpu.dot_dimension_numbers<[1], [0], [0], [1], [0, 0, 1, 1], [], []>} : vector<8x8xf32>, vector<8x8xf32>, vector<8x8xf32> -> vector<8x8xf32>
    %c0_17 = arith.constant 0 : index
    %c0_18 = arith.constant 0 : index
    %49 = vector.load %arg4[%c0_17, %c0_18] : memref<32x32xf32, #tpu.memory_space<vmem>>, vector<8x32xf32>
    %cst_19 = arith.constant dense<0.000000e+00> : vector<8x32xf32>
    %50 = tpu.matmul %48, %49, %cst_19 {dimension_numbers = #tpu.dot_dimension_numbers<[1], [0], [0], [1], [0, 0, 1, 1], [], []>} : vector<8x8xf32>, vector<8x32xf32>, vector<8x32xf32> -> vector<8x32xf32>
    %51 = arith.addf %30, %50 : vector<8x32xf32>
    %52 = vector.extract_strided_slice %27 {offsets = [0, 8], sizes = [8, 8], strides = [1, 1]} : vector<16x32xf32> to vector<8x8xf32>
    %53 = vector.extract_strided_slice %28 {offsets = [0, 8], sizes = [8, 8], strides = [1, 1]} : vector<16x32xf32> to vector<8x8xf32>
    %54 = vector.extract_strided_slice %29 {offsets = [0, 8], sizes = [8, 8], strides = [1, 1]} : vector<16x32xf32> to vector<8x8xf32>
    %55 = tpu.transpose %53, [1, 0] : vector<8x8xf32> -> vector<8x8xf32>
    %cst_20 = arith.constant dense<0.000000e+00> : vector<8x8xf32>
    %56 = tpu.matmul %52, %55, %cst_20 {dimension_numbers = #tpu.dot_dimension_numbers<[1], [0], [0], [1], [0, 0, 1, 1], [], []>} : vector<8x8xf32>, vector<8x8xf32>, vector<8x8xf32> -> vector<8x8xf32>
    %cst_21 = arith.constant 0.353553385 : f32
    %57 = vector.broadcast %cst_21 : f32 to vector<8x8xf32>
    %58 = arith.mulf %56, %57 : vector<8x8xf32>
    %cst_22 = arith.constant dense<0xFF800000> : vector<8xf32>
    %59 = vector.multi_reduction <maximumf>, %58, %cst_22 [1] : vector<8x8xf32> to vector<8xf32>
    %60 = vector.shape_cast %59 : vector<8xf32> to vector<8x1xf32>
    %61 = vector.broadcast %60 : vector<8x1xf32> to vector<8x8xf32>
    %62 = arith.subf %58, %61 : vector<8x8xf32>
    %63 = math.exp %62 : vector<8x8xf32>
    %cst_23 = arith.constant dense<0.000000e+00> : vector<8xf32>
    %64 = vector.multi_reduction <add>, %63, %cst_23 [1] : vector<8x8xf32> to vector<8xf32>
    %65 = vector.shape_cast %64 : vector<8xf32> to vector<8x1xf32>
    %66 = tpu.reciprocal %65 {approx = true} : vector<8x1xf32> -> vector<8x1xf32>
    %67 = vector.broadcast %66 : vector<8x1xf32> to vector<8x8xf32>
    %68 = arith.mulf %63, %67 : vector<8x8xf32>
    %cst_24 = arith.constant dense<0.000000e+00> : vector<8x8xf32>
    %69 = tpu.matmul %68, %54, %cst_24 {dimension_numbers = #tpu.dot_dimension_numbers<[1], [0], [0], [1], [0, 0, 1, 1], [], []>} : vector<8x8xf32>, vector<8x8xf32>, vector<8x8xf32> -> vector<8x8xf32>
    %c8 = arith.constant 8 : index
    %c0_25 = arith.constant 0 : index
    %70 = vector.load %arg4[%c8, %c0_25] : memref<32x32xf32, #tpu.memory_space<vmem>>, vector<8x32xf32>
    %cst_26 = arith.constant dense<0.000000e+00> : vector<8x32xf32>
    %71 = tpu.matmul %69, %70, %cst_26 {dimension_numbers = #tpu.dot_dimension_numbers<[1], [0], [0], [1], [0, 0, 1, 1], [], []>} : vector<8x8xf32>, vector<8x32xf32>, vector<8x32xf32> -> vector<8x32xf32>
    %72 = arith.addf %51, %71 : vector<8x32xf32>
    %73 = vector.extract_strided_slice %27 {offsets = [0, 16], sizes = [8, 8], strides = [1, 1]} : vector<16x32xf32> to vector<8x8xf32>
    %74 = vector.extract_strided_slice %28 {offsets = [0, 16], sizes = [8, 8], strides = [1, 1]} : vector<16x32xf32> to vector<8x8xf32>
    %75 = vector.extract_strided_slice %29 {offsets = [0, 16], sizes = [8, 8], strides = [1, 1]} : vector<16x32xf32> to vector<8x8xf32>
    %76 = tpu.transpose %74, [1, 0] : vector<8x8xf32> -> vector<8x8xf32>
    %cst_27 = arith.constant dense<0.000000e+00> : vector<8x8xf32>
    %77 = tpu.matmul %73, %76, %cst_27 {dimension_numbers = #tpu.dot_dimension_numbers<[1], [0], [0], [1], [0, 0, 1, 1], [], []>} : vector<8x8xf32>, vector<8x8xf32>, vector<8x8xf32> -> vector<8x8xf32>
    %cst_28 = arith.constant 0.353553385 : f32
    %78 = vector.broadcast %cst_28 : f32 to vector<8x8xf32>
    %79 = arith.mulf %77, %78 : vector<8x8xf32>
    %cst_29 = arith.constant dense<0xFF800000> : vector<8xf32>
    %80 = vector.multi_reduction <maximumf>, %79, %cst_29 [1] : vector<8x8xf32> to vector<8xf32>
    %81 = vector.shape_cast %80 : vector<8xf32> to vector<8x1xf32>
    %82 = vector.broadcast %81 : vector<8x1xf32> to vector<8x8xf32>
    %83 = arith.subf %79, %82 : vector<8x8xf32>
    %84 = math.exp %83 : vector<8x8xf32>
    %cst_30 = arith.constant dense<0.000000e+00> : vector<8xf32>
    %85 = vector.multi_reduction <add>, %84, %cst_30 [1] : vector<8x8xf32> to vector<8xf32>
    %86 = vector.shape_cast %85 : vector<8xf32> to vector<8x1xf32>
    %87 = tpu.reciprocal %86 {approx = true} : vector<8x1xf32> -> vector<8x1xf32>
    %88 = vector.broadcast %87 : vector<8x1xf32> to vector<8x8xf32>
    %89 = arith.mulf %84, %88 : vector<8x8xf32>
    %cst_31 = arith.constant dense<0.000000e+00> : vector<8x8xf32>
    %90 = tpu.matmul %89, %75, %cst_31 {dimension_numbers = #tpu.dot_dimension_numbers<[1], [0], [0], [1], [0, 0, 1, 1], [], []>} : vector<8x8xf32>, vector<8x8xf32>, vector<8x8xf32> -> vector<8x8xf32>
    %c16 = arith.constant 16 : index
    %c0_32 = arith.constant 0 : index
    %91 = vector.load %arg4[%c16, %c0_32] : memref<32x32xf32, #tpu.memory_space<vmem>>, vector<8x32xf32>
    %cst_33 = arith.constant dense<0.000000e+00> : vector<8x32xf32>
    %92 = tpu.matmul %90, %91, %cst_33 {dimension_numbers = #tpu.dot_dimension_numbers<[1], [0], [0], [1], [0, 0, 1, 1], [], []>} : vector<8x8xf32>, vector<8x32xf32>, vector<8x32xf32> -> vector<8x32xf32>
    %93 = arith.addf %72, %92 : vector<8x32xf32>
    %94 = vector.extract_strided_slice %27 {offsets = [0, 24], sizes = [8, 8], strides = [1, 1]} : vector<16x32xf32> to vector<8x8xf32>
    %95 = vector.extract_strided_slice %28 {offsets = [0, 24], sizes = [8, 8], strides = [1, 1]} : vector<16x32xf32> to vector<8x8xf32>
    %96 = vector.extract_strided_slice %29 {offsets = [0, 24], sizes = [8, 8], strides = [1, 1]} : vector<16x32xf32> to vector<8x8xf32>
    %97 = tpu.transpose %95, [1, 0] : vector<8x8xf32> -> vector<8x8xf32>
    %cst_34 = arith.constant dense<0.000000e+00> : vector<8x8xf32>
    %98 = tpu.matmul %94, %97, %cst_34 {dimension_numbers = #tpu.dot_dimension_numbers<[1], [0], [0], [1], [0, 0, 1, 1], [], []>} : vector<8x8xf32>, vector<8x8xf32>, vector<8x8xf32> -> vector<8x8xf32>
    %cst_35 = arith.constant 0.353553385 : f32
    %99 = vector.broadcast %cst_35 : f32 to vector<8x8xf32>
    %100 = arith.mulf %98, %99 : vector<8x8xf32>
    %cst_36 = arith.constant dense<0xFF800000> : vector<8xf32>
    %101 = vector.multi_reduction <maximumf>, %100, %cst_36 [1] : vector<8x8xf32> to vector<8xf32>
    %102 = vector.shape_cast %101 : vector<8xf32> to vector<8x1xf32>
    %103 = vector.broadcast %102 : vector<8x1xf32> to vector<8x8xf32>
    %104 = arith.subf %100, %103 : vector<8x8xf32>
    %105 = math.exp %104 : vector<8x8xf32>
    %cst_37 = arith.constant dense<0.000000e+00> : vector<8xf32>
    %106 = vector.multi_reduction <add>, %105, %cst_37 [1] : vector<8x8xf32> to vector<8xf32>
    %107 = vector.shape_cast %106 : vector<8xf32> to vector<8x1xf32>
    %108 = tpu.reciprocal %107 {approx = true} : vector<8x1xf32> -> vector<8x1xf32>
    %109 = vector.broadcast %108 : vector<8x1xf32> to vector<8x8xf32>
    %110 = arith.mulf %105, %109 : vector<8x8xf32>
    %cst_38 = arith.constant dense<0.000000e+00> : vector<8x8xf32>
    %111 = tpu.matmul %110, %96, %cst_38 {dimension_numbers = #tpu.dot_dimension_numbers<[1], [0], [0], [1], [0, 0, 1, 1], [], []>} : vector<8x8xf32>, vector<8x8xf32>, vector<8x8xf32> -> vector<8x8xf32>
    %c24 = arith.constant 24 : index
    %c0_39 = arith.constant 0 : index
    %112 = vector.load %arg4[%c24, %c0_39] : memref<32x32xf32, #tpu.memory_space<vmem>>, vector<8x32xf32>
    %cst_40 = arith.constant dense<0.000000e+00> : vector<8x32xf32>
    %113 = tpu.matmul %111, %112, %cst_40 {dimension_numbers = #tpu.dot_dimension_numbers<[1], [0], [0], [1], [0, 0, 1, 1], [], []>} : vector<8x8xf32>, vector<8x32xf32>, vector<8x32xf32> -> vector<8x32xf32>
    %114 = arith.addf %93, %113 : vector<8x32xf32>
    %cst_41 = arith.constant 0.000000e+00 : f32
    %115 = vector.broadcast %cst_41 : f32 to vector<8x32xf32>
    %116 = vector.extract_strided_slice %27 {offsets = [8, 0], sizes = [8, 8], strides = [1, 1]} : vector<16x32xf32> to vector<8x8xf32>
    %117 = vector.extract_strided_slice %28 {offsets = [8, 0], sizes = [8, 8], strides = [1, 1]} : vector<16x32xf32> to vector<8x8xf32>
    %118 = vector.extract_strided_slice %29 {offsets = [8, 0], sizes = [8, 8], strides = [1, 1]} : vector<16x32xf32> to vector<8x8xf32>
    %119 = tpu.transpose %117, [1, 0] : vector<8x8xf32> -> vector<8x8xf32>
    %cst_42 = arith.constant dense<0.000000e+00> : vector<8x8xf32>
    %120 = tpu.matmul %116, %119, %cst_42 {dimension_numbers = #tpu.dot_dimension_numbers<[1], [0], [0], [1], [0, 0, 1, 1], [], []>} : vector<8x8xf32>, vector<8x8xf32>, vector<8x8xf32> -> vector<8x8xf32>
    %cst_43 = arith.constant 0.353553385 : f32
    %121 = vector.broadcast %cst_43 : f32 to vector<8x8xf32>
    %122 = arith.mulf %120, %121 : vector<8x8xf32>
    %cst_44 = arith.constant dense<0xFF800000> : vector<8xf32>
    %123 = vector.multi_reduction <maximumf>, %122, %cst_44 [1] : vector<8x8xf32> to vector<8xf32>
    %124 = vector.shape_cast %123 : vector<8xf32> to vector<8x1xf32>
    %125 = vector.broadcast %124 : vector<8x1xf32> to vector<8x8xf32>
    %126 = arith.subf %122, %125 : vector<8x8xf32>
    %127 = math.exp %126 : vector<8x8xf32>
    %cst_45 = arith.constant dense<0.000000e+00> : vector<8xf32>
    %128 = vector.multi_reduction <add>, %127, %cst_45 [1] : vector<8x8xf32> to vector<8xf32>
    %129 = vector.shape_cast %128 : vector<8xf32> to vector<8x1xf32>
    %130 = tpu.reciprocal %129 {approx = true} : vector<8x1xf32> -> vector<8x1xf32>
    %131 = vector.broadcast %130 : vector<8x1xf32> to vector<8x8xf32>
    %132 = arith.mulf %127, %131 : vector<8x8xf32>
    %cst_46 = arith.constant dense<0.000000e+00> : vector<8x8xf32>
    %133 = tpu.matmul %132, %118, %cst_46 {dimension_numbers = #tpu.dot_dimension_numbers<[1], [0], [0], [1], [0, 0, 1, 1], [], []>} : vector<8x8xf32>, vector<8x8xf32>, vector<8x8xf32> -> vector<8x8xf32>
    %c0_47 = arith.constant 0 : index
    %c0_48 = arith.constant 0 : index
    %134 = vector.load %arg4[%c0_47, %c0_48] : memref<32x32xf32, #tpu.memory_space<vmem>>, vector<8x32xf32>
    %cst_49 = arith.constant dense<0.000000e+00> : vector<8x32xf32>
    %135 = tpu.matmul %133, %134, %cst_49 {dimension_numbers = #tpu.dot_dimension_numbers<[1], [0], [0], [1], [0, 0, 1, 1], [], []>} : vector<8x8xf32>, vector<8x32xf32>, vector<8x32xf32> -> vector<8x32xf32>
    %136 = arith.addf %115, %135 : vector<8x32xf32>
    %137 = vector.extract_strided_slice %27 {offsets = [8, 8], sizes = [8, 8], strides = [1, 1]} : vector<16x32xf32> to vector<8x8xf32>
    %138 = vector.extract_strided_slice %28 {offsets = [8, 8], sizes = [8, 8], strides = [1, 1]} : vector<16x32xf32> to vector<8x8xf32>
    %139 = vector.extract_strided_slice %29 {offsets = [8, 8], sizes = [8, 8], strides = [1, 1]} : vector<16x32xf32> to vector<8x8xf32>
    %140 = tpu.transpose %138, [1, 0] : vector<8x8xf32> -> vector<8x8xf32>
    %cst_50 = arith.constant dense<0.000000e+00> : vector<8x8xf32>
    %141 = tpu.matmul %137, %140, %cst_50 {dimension_numbers = #tpu.dot_dimension_numbers<[1], [0], [0], [1], [0, 0, 1, 1], [], []>} : vector<8x8xf32>, vector<8x8xf32>, vector<8x8xf32> -> vector<8x8xf32>
    %cst_51 = arith.constant 0.353553385 : f32
    %142 = vector.broadcast %cst_51 : f32 to vector<8x8xf32>
    %143 = arith.mulf %141, %142 : vector<8x8xf32>
    %cst_52 = arith.constant dense<0xFF800000> : vector<8xf32>
    %144 = vector.multi_reduction <maximumf>, %143, %cst_52 [1] : vector<8x8xf32> to vector<8xf32>
    %145 = vector.shape_cast %144 : vector<8xf32> to vector<8x1xf32>
    %146 = vector.broadcast %145 : vector<8x1xf32> to vector<8x8xf32>
    %147 = arith.subf %143, %146 : vector<8x8xf32>
    %148 = math.exp %147 : vector<8x8xf32>
    %cst_53 = arith.constant dense<0.000000e+00> : vector<8xf32>
    %149 = vector.multi_reduction <add>, %148, %cst_53 [1] : vector<8x8xf32> to vector<8xf32>
    %150 = vector.shape_cast %149 : vector<8xf32> to vector<8x1xf32>
    %151 = tpu.reciprocal %150 {approx = true} : vector<8x1xf32> -> vector<8x1xf32>
    %152 = vector.broadcast %151 : vector<8x1xf32> to vector<8x8xf32>
    %153 = arith.mulf %148, %152 : vector<8x8xf32>
    %cst_54 = arith.constant dense<0.000000e+00> : vector<8x8xf32>
    %154 = tpu.matmul %153, %139, %cst_54 {dimension_numbers = #tpu.dot_dimension_numbers<[1], [0], [0], [1], [0, 0, 1, 1], [], []>} : vector<8x8xf32>, vector<8x8xf32>, vector<8x8xf32> -> vector<8x8xf32>
    %c8_55 = arith.constant 8 : index
    %c0_56 = arith.constant 0 : index
    %155 = vector.load %arg4[%c8_55, %c0_56] : memref<32x32xf32, #tpu.memory_space<vmem>>, vector<8x32xf32>
    %cst_57 = arith.constant dense<0.000000e+00> : vector<8x32xf32>
    %156 = tpu.matmul %154, %155, %cst_57 {dimension_numbers = #tpu.dot_dimension_numbers<[1], [0], [0], [1], [0, 0, 1, 1], [], []>} : vector<8x8xf32>, vector<8x32xf32>, vector<8x32xf32> -> vector<8x32xf32>
    %157 = arith.addf %136, %156 : vector<8x32xf32>
    %158 = vector.extract_strided_slice %27 {offsets = [8, 16], sizes = [8, 8], strides = [1, 1]} : vector<16x32xf32> to vector<8x8xf32>
    %159 = vector.extract_strided_slice %28 {offsets = [8, 16], sizes = [8, 8], strides = [1, 1]} : vector<16x32xf32> to vector<8x8xf32>
    %160 = vector.extract_strided_slice %29 {offsets = [8, 16], sizes = [8, 8], strides = [1, 1]} : vector<16x32xf32> to vector<8x8xf32>
    %161 = tpu.transpose %159, [1, 0] : vector<8x8xf32> -> vector<8x8xf32>
    %cst_58 = arith.constant dense<0.000000e+00> : vector<8x8xf32>
    %162 = tpu.matmul %158, %161, %cst_58 {dimension_numbers = #tpu.dot_dimension_numbers<[1], [0], [0], [1], [0, 0, 1, 1], [], []>} : vector<8x8xf32>, vector<8x8xf32>, vector<8x8xf32> -> vector<8x8xf32>
    %cst_59 = arith.constant 0.353553385 : f32
    %163 = vector.broadcast %cst_59 : f32 to vector<8x8xf32>
    %164 = arith.mulf %162, %163 : vector<8x8xf32>
    %cst_60 = arith.constant dense<0xFF800000> : vector<8xf32>
    %165 = vector.multi_reduction <maximumf>, %164, %cst_60 [1] : vector<8x8xf32> to vector<8xf32>
    %166 = vector.shape_cast %165 : vector<8xf32> to vector<8x1xf32>
    %167 = vector.broadcast %166 : vector<8x1xf32> to vector<8x8xf32>
    %168 = arith.subf %164, %167 : vector<8x8xf32>
    %169 = math.exp %168 : vector<8x8xf32>
    %cst_61 = arith.constant dense<0.000000e+00> : vector<8xf32>
    %170 = vector.multi_reduction <add>, %169, %cst_61 [1] : vector<8x8xf32> to vector<8xf32>
    %171 = vector.shape_cast %170 : vector<8xf32> to vector<8x1xf32>
    %172 = tpu.reciprocal %171 {approx = true} : vector<8x1xf32> -> vector<8x1xf32>
    %173 = vector.broadcast %172 : vector<8x1xf32> to vector<8x8xf32>
    %174 = arith.mulf %169, %173 : vector<8x8xf32>
    %cst_62 = arith.constant dense<0.000000e+00> : vector<8x8xf32>
    %175 = tpu.matmul %174, %160, %cst_62 {dimension_numbers = #tpu.dot_dimension_numbers<[1], [0], [0], [1], [0, 0, 1, 1], [], []>} : vector<8x8xf32>, vector<8x8xf32>, vector<8x8xf32> -> vector<8x8xf32>
    %c16_63 = arith.constant 16 : index
    %c0_64 = arith.constant 0 : index
    %176 = vector.load %arg4[%c16_63, %c0_64] : memref<32x32xf32, #tpu.memory_space<vmem>>, vector<8x32xf32>
    %cst_65 = arith.constant dense<0.000000e+00> : vector<8x32xf32>
    %177 = tpu.matmul %175, %176, %cst_65 {dimension_numbers = #tpu.dot_dimension_numbers<[1], [0], [0], [1], [0, 0, 1, 1], [], []>} : vector<8x8xf32>, vector<8x32xf32>, vector<8x32xf32> -> vector<8x32xf32>
    %178 = arith.addf %157, %177 : vector<8x32xf32>
    %179 = vector.extract_strided_slice %27 {offsets = [8, 24], sizes = [8, 8], strides = [1, 1]} : vector<16x32xf32> to vector<8x8xf32>
    %180 = vector.extract_strided_slice %28 {offsets = [8, 24], sizes = [8, 8], strides = [1, 1]} : vector<16x32xf32> to vector<8x8xf32>
    %181 = vector.extract_strided_slice %29 {offsets = [8, 24], sizes = [8, 8], strides = [1, 1]} : vector<16x32xf32> to vector<8x8xf32>
    %182 = tpu.transpose %180, [1, 0] : vector<8x8xf32> -> vector<8x8xf32>
    %cst_66 = arith.constant dense<0.000000e+00> : vector<8x8xf32>
    %183 = tpu.matmul %179, %182, %cst_66 {dimension_numbers = #tpu.dot_dimension_numbers<[1], [0], [0], [1], [0, 0, 1, 1], [], []>} : vector<8x8xf32>, vector<8x8xf32>, vector<8x8xf32> -> vector<8x8xf32>
    %cst_67 = arith.constant 0.353553385 : f32
    %184 = vector.broadcast %cst_67 : f32 to vector<8x8xf32>
    %185 = arith.mulf %183, %184 : vector<8x8xf32>
    %cst_68 = arith.constant dense<0xFF800000> : vector<8xf32>
    %186 = vector.multi_reduction <maximumf>, %185, %cst_68 [1] : vector<8x8xf32> to vector<8xf32>
    %187 = vector.shape_cast %186 : vector<8xf32> to vector<8x1xf32>
    %188 = vector.broadcast %187 : vector<8x1xf32> to vector<8x8xf32>
    %189 = arith.subf %185, %188 : vector<8x8xf32>
    %190 = math.exp %189 : vector<8x8xf32>
    %cst_69 = arith.constant dense<0.000000e+00> : vector<8xf32>
    %191 = vector.multi_reduction <add>, %190, %cst_69 [1] : vector<8x8xf32> to vector<8xf32>
    %192 = vector.shape_cast %191 : vector<8xf32> to vector<8x1xf32>
    %193 = tpu.reciprocal %192 {approx = true} : vector<8x1xf32> -> vector<8x1xf32>
    %194 = vector.broadcast %193 : vector<8x1xf32> to vector<8x8xf32>
    %195 = arith.mulf %190, %194 : vector<8x8xf32>
    %cst_70 = arith.constant dense<0.000000e+00> : vector<8x8xf32>
    %196 = tpu.matmul %195, %181, %cst_70 {dimension_numbers = #tpu.dot_dimension_numbers<[1], [0], [0], [1], [0, 0, 1, 1], [], []>} : vector<8x8xf32>, vector<8x8xf32>, vector<8x8xf32> -> vector<8x8xf32>
    %c24_71 = arith.constant 24 : index
    %c0_72 = arith.constant 0 : index
    %197 = vector.load %arg4[%c24_71, %c0_72] : memref<32x32xf32, #tpu.memory_space<vmem>>, vector<8x32xf32>
    %cst_73 = arith.constant dense<0.000000e+00> : vector<8x32xf32>
    %198 = tpu.matmul %196, %197, %cst_73 {dimension_numbers = #tpu.dot_dimension_numbers<[1], [0], [0], [1], [0, 0, 1, 1], [], []>} : vector<8x8xf32>, vector<8x32xf32>, vector<8x32xf32> -> vector<8x32xf32>
    %199 = arith.addf %178, %198 : vector<8x32xf32>
    %200 = tpu.concatenate %114, %199 in 0 : vector<8x32xf32>, vector<8x32xf32> -> vector<16x32xf32>
    %c2 = arith.constant 2 : index
    %c0_74 = arith.constant 0 : index
    %201 = vector.load %arg1[%c2, %c0_74] : memref<8x32xf32, #tpu.memory_space<vmem>>, vector<1x32xf32>
    %202 = vector.broadcast %201 : vector<1x32xf32> to vector<16x32xf32>
    %203 = arith.addf %200, %202 : vector<16x32xf32>
    %204 = arith.addf %0, %203 : vector<16x32xf32>
    %c3 = arith.constant 3 : index
    %c0_75 = arith.constant 0 : index
    %205 = vector.load %arg1[%c3, %c0_75] : memref<8x32xf32, #tpu.memory_space<vmem>>, vector<1x32xf32>
    %c4 = arith.constant 4 : index
    %c0_76 = arith.constant 0 : index
    %206 = vector.load %arg1[%c4, %c0_76] : memref<8x32xf32, #tpu.memory_space<vmem>>, vector<1x32xf32>
    %cst_77 = arith.constant dense<0.000000e+00> : vector<16xf32>
    %207 = vector.multi_reduction <add>, %204, %cst_77 [1] : vector<16x32xf32> to vector<16xf32>
    %208 = vector.shape_cast %207 : vector<16xf32> to vector<16x1xf32>
    %cst_78 = arith.constant 3.200000e+01 : f32
    %209 = vector.broadcast %cst_78 : f32 to vector<16x1xf32>
    %210 = arith.divf %208, %209 : vector<16x1xf32>
    %211 = vector.broadcast %210 : vector<16x1xf32> to vector<16x32xf32>
    %212 = arith.subf %204, %211 : vector<16x32xf32>
    %213 = arith.mulf %212, %212 : vector<16x32xf32>
    %cst_79 = arith.constant dense<0.000000e+00> : vector<16xf32>
    %214 = vector.multi_reduction <add>, %213, %cst_79 [1] : vector<16x32xf32> to vector<16xf32>
    %215 = vector.shape_cast %214 : vector<16xf32> to vector<16x1xf32>
    %cst_80 = arith.constant 3.200000e+01 : f32
    %216 = vector.broadcast %cst_80 : f32 to vector<16x1xf32>
    %217 = arith.divf %215, %216 : vector<16x1xf32>
    %218 = vector.broadcast %210 : vector<16x1xf32> to vector<16x32xf32>
    %219 = arith.subf %204, %218 : vector<16x32xf32>
    %cst_81 = arith.constant 9.99999974E-6 : f32
    %220 = vector.broadcast %cst_81 : f32 to vector<16x1xf32>
    %221 = arith.addf %217, %220 : vector<16x1xf32>
    %222 = math.rsqrt %221 : vector<16x1xf32>
    %223 = vector.broadcast %222 : vector<16x1xf32> to vector<16x32xf32>
    %224 = arith.mulf %219, %223 : vector<16x32xf32>
    %225 = vector.broadcast %205 : vector<1x32xf32> to vector<16x32xf32>
    %226 = arith.mulf %224, %225 : vector<16x32xf32>
    %227 = vector.broadcast %206 : vector<1x32xf32> to vector<16x32xf32>
    %228 = arith.addf %226, %227 : vector<16x32xf32>
    %c0_82 = arith.constant 0 : index
    %c0_83 = arith.constant 0 : index
    %229 = vector.load %arg5[%c0_82, %c0_83] : memref<32x128xf32, #tpu.memory_space<vmem>>, vector<32x128xf32>
    %cst_84 = arith.constant dense<0.000000e+00> : vector<16x128xf32>
    %230 = tpu.matmul %228, %229, %cst_84 {dimension_numbers = #tpu.dot_dimension_numbers<[1], [0], [0], [1], [0, 0, 1, 1], [], []>} : vector<16x32xf32>, vector<32x128xf32>, vector<16x128xf32> -> vector<16x128xf32>
    %c0_85 = arith.constant 0 : index
    %c0_86 = arith.constant 0 : index
    %231 = vector.load %arg2[%c0_85, %c0_86] : memref<1x128xf32, #tpu.memory_space<vmem>>, vector<1x128xf32>
    %232 = vector.broadcast %231 : vector<1x128xf32> to vector<16x128xf32>
    %233 = arith.addf %230, %232 : vector<16x128xf32>
    %cst_87 = arith.constant 0.636619746 : f32
    %234 = math.sqrt %cst_87 : f32
    %cst_88 = arith.constant 5.000000e-01 : f32
    %235 = vector.broadcast %cst_88 : f32 to vector<16x128xf32>
    %236 = arith.mulf %235, %233 : vector<16x128xf32>
    %237 = arith.mulf %233, %233 : vector<16x128xf32>
    %238 = arith.mulf %233, %237 : vector<16x128xf32>
    %cst_89 = arith.constant 4.471500e-02 : f32
    %239 = vector.broadcast %cst_89 : f32 to vector<16x128xf32>
    %240 = arith.mulf %239, %238 : vector<16x128xf32>
    %241 = arith.addf %233, %240 : vector<16x128xf32>
    %242 = vector.broadcast %234 : f32 to vector<16x128xf32>
    %243 = arith.mulf %242, %241 : vector<16x128xf32>
    %244 = math.tanh %243 : vector<16x128xf32>
    %cst_90 = arith.constant 1.000000e+00 : f32
    %245 = vector.broadcast %cst_90 : f32 to vector<16x128xf32>
    %246 = arith.addf %245, %244 : vector<16x128xf32>
    %247 = arith.mulf %236, %246 : vector<16x128xf32>
    %c0_91 = arith.constant 0 : index
    %c0_92 = arith.constant 0 : index
    %248 = vector.load %arg6[%c0_91, %c0_92] : memref<128x32xf32, #tpu.memory_space<vmem>>, vector<128x32xf32>
    %cst_93 = arith.constant dense<0.000000e+00> : vector<16x32xf32>
    %249 = tpu.matmul %247, %248, %cst_93 {dimension_numbers = #tpu.dot_dimension_numbers<[1], [0], [0], [1], [0, 0, 1, 1], [], []>} : vector<16x128xf32>, vector<128x32xf32>, vector<16x32xf32> -> vector<16x32xf32>
    %c5 = arith.constant 5 : index
    %c0_94 = arith.constant 0 : index
    %250 = vector.load %arg1[%c5, %c0_94] : memref<8x32xf32, #tpu.memory_space<vmem>>, vector<1x32xf32>
    %251 = vector.broadcast %250 : vector<1x32xf32> to vector<16x32xf32>
    %252 = arith.addf %249, %251 : vector<16x32xf32>
    %253 = arith.addf %204, %252 : vector<16x32xf32>
    %c0_95 = arith.constant 0 : index
    %c0_96 = arith.constant 0 : index
    %254 = vector.load %arg7[%c0_95, %c0_96] : memref<16x32xf32, #tpu.memory_space<vmem>>, vector<16x32xf32>
    tpu.vector_store %arg7[%c0_95, %c0_96], %253 {strides = array<i32>} : memref<16x32xf32, #tpu.memory_space<vmem>>, vector<16x32xf32>,
    return
  }
}

</mosaic_0001>

<bundles_post_ra>
// kernel: tpu_custom_call.1
= control target key start
LH: loop header
LB: loop body
LE: loop exit
PB: predicated region body
PF: predicated region fallthrough
CT: control target
= control target key end

     0   :  { %vm31_vm0 = vcmask 261120   ;;  %s3126_s0 = inlined_call_operand.vmem [shape: f32[16,32], index: 0, kind: input, shape index: {}]   ;;  %s3127_s1 = inlined_call_operand.vmem [shape: f32[8,32], index: 1, kind: input, shape index: {}]   ;;  %s3128_s2 = inlined_call_operand.vmem [shape: f32[1,128], index: 2, kind: input, shape index: {}]   ;;  %s3129_s3 = inlined_call_operand.vmem [shape: f32[32,96], index: 3, kind: input, shape index: {}]   ;;  %s3130_s4 = inlined_call_operand.vmem [shape: f32[32,32], index: 4, kind: input, shape index: {}]   ;;  %s3131_s5 = inlined_call_operand.vmem [shape: f32[32,128], index: 5, kind: input, shape index: {}]   ;;  %s3132_s6 = inlined_call_operand.vmem [shape: f32[128,32], index: 6, kind: input, shape index: {}]   ;;  %s3133_s7 = inlined_call_operand.hbm [shape: f32[16,32], index: 7, kind: output, shape index: {}]  }
   0x1   :  { %v2789_v0 = vld [vmem:[%s3126_s0] sm:$0xff]  ;;  %v2794_v1 = vld [vmem:[%s3126_s0 + $0x8] sm:$0xff] }
   0x2   :  { %12 = vsyncpa [#allocation3], 0  ;;  %v32_v2 = vsel %vm31_vm0, %v2789_v0, 0.0  ;;  %v35_v3 = vsel %vm31_vm0, %v2794_v1, 0.0  ;;  %v74_v14 = vld [vmem:[%s3129_s3 + $0x18] sm:$0xff]  ;;  %v73_v15 = vld [vmem:[%s3129_s3 + $0x10] sm:$0xff] }
   0x3   :  { %33 = vadd.xlane.f32.xlu0 %v32_v2  ;;  %2471 = vmatprep.subr.mxu0 %v74_v14  ;;  %v72_v16 = vld [vmem:[%s3129_s3 + $0x8] sm:$0xff]  ;;  %v71_v17 = vld [vmem:[%s3129_s3] sm:$0xff]  ;;  %v2730_v34 = vmov 0.0   ;;  %vm2731_vm1 = vmmov 0   ;;  %s2732_s3 = smov 96   ;;  %s2733_s16 = smov 88  }
   0x4   :  { %2472 = vmatpush3.msra.mxu0 %v74_v14  ;;  %v2350_v25 = vld [vmem:[%s3127_s1] ss:$0 sm:$0xff]  ;;  %v2351_v27 = vld [vmem:[%s3127_s1 + $0x1] ss:$0 sm:$0xff]  ;;  %2507 = vmatprep.subr.mxu1 %v2730_v34  ;;  %vm159_vm2 = vcmask 64512   ;;  %s2734_s17 = smov 64  }
   0x5   :  { %2473 = vmatprep.subr.mxu0 %v73_v15  ;;  %2509 = vmatprep.mubr.msk.f32.mxu1 %vm2731_vm1, %v2730_v34  ;;  %s2735_s18 = smov 120   ;;  %v2862_v53 = vld [vmem:[%s3130_s4] sm:$0xff]  ;;  %s2736_s21 = smov 56  }
   0x6   :  { %2474 = vmatpush3.msra.mxu0 %v73_v15  ;;  %2508 = vmatpush3.msra.mxu1 %v2862_v53  ;;  %s2737_s22 = smov 112   ;;  %s2738_s23 = smov 80  }
   0x7   :  { %36 = vadd.xlane.f32.xlu0 %v35_v3  ;;  %2475 = vmatprep.subr.mxu0 %v72_v16  ;;  %s2739_s26 = smov 72   ;;  %s2740_s27 = smov 104  }
   0x8   :  { %2476 = vmatpush3.msra.mxu0 %v72_v16  ;;  %2517 = vmatprep.subr.mxu1 %v2730_v34  ;;  %s2741_s0 = smov 48   ;;  %s2742_s30 = smov 40  }
   0x9   :  { %2477 = vmatprep.subr.mxu0 %v71_v17 }
   0xa   :  { %2478 = vmatpush3.msra.mxu0 %v71_v17 }
   0xb   :  { %2482 = vmatprep.subr.mxu0 %v2730_v34 }
  0x8c   :  { %v34_v4 = vpop.xlane.xlu0 %33 }
  0x8d   :  { %v39_v5 = vmul.f32 0.03125, %v34_v4 }
  0x8f   :  { %v41_v6 = vsub.f32 %v2789_v0, %v39_v5 }
  0x90   :  { %v37_v7 = vpop.xlane.xlu0 %36 }
  0x91   :  { %v40_v8 = vmul.f32 0.03125, %v37_v7  ;;  %v43_v9 = vmul.f32 %v41_v6, %v41_v6 }
  0x93   :  { %v42_v10 = vsub.f32 %v2794_v1, %v40_v8  ;;  %v45_v11 = vsel %vm31_vm0, %v43_v9, 0.0  ;;  %v2883_v9 = vld [vmem:[%s3130_s4 + $0x8] sm:$0xff] }
  0x94   :  { %46 = vadd.xlane.f32.xlu1 %v45_v11 }
  0x95   :  { %v44_v12 = vmul.f32 %v42_v10, %v42_v10 }
  0x97   :  { %v48_v13 = vsel %vm31_vm0, %v44_v12, 0.0 }
  0x98   :  { %49 = vadd.xlane.f32.xlu1 %v48_v13 }
 0x11d   :  { %v47_v18 = vpop.xlane.xlu1 %46 }
 0x11e   :  { %v51_v19 = vmul.f32 0.03125, %v47_v18 }
 0x120   :  { %v53_v20 = vadd.f32 1e-05, %v51_v19 }
 0x121   :  { %v50_v21 = vpop.xlane.xlu1 %49 }
 0x122   :  { %2664 = vrsqrt.f32 %v53_v20  ;;  %v52_v22 = vmul.f32 0.03125, %v50_v21 }
 0x124   :  { %v54_v23 = vadd.f32 1e-05, %v52_v22 }
 0x126   :  { %2666 = vrsqrt.f32 %v54_v23 }
 0x12f   :  { %v2665_v24 = vpop.eup %2664 }
 0x130   :  { %v57_v26 = vmul.f32 %v2665_v24, %v41_v6 }
 0x132   :  { %v63_v28 = vmul.f32 %v2350_v25, %v57_v26 }
 0x133   :  { %v2667_v29 = vpop.eup %2666 }
 0x134   :  { %v58_v30 = vmul.f32 %v2667_v29, %v42_v10  ;;  %v69_v31 = vadd.f32 %v2351_v27, %v63_v28 }
 0x136   :  { %v64_v32 = vmul.f32 %v2350_v25, %v58_v30  ;;  %2479 = vmatprep.mubr.msk.f32.mxu0 %vm31_vm0, %v69_v31  ;;  %v2920_v31 = vld [vmem:[%s3130_s4 + $0x10] sm:$0xff] }
 0x138   :  { %v70_v33 = vadd.f32 %v2351_v27, %v64_v32 }
 0x13a   :  { %2480 = vmatmul.mubr.msk.f32.vlgmr.msra.gmra.mxu0 %vm31_vm0, %v70_v33 }
 0x13b   :  { %2484 = vmatprep.mubr.msk.f32.mxu0 %vm2731_vm1, %v2730_v34 }
 0x1fa   :  { %v2830_v35 = vpop.f32.mrf.mxu0 }
 0x1fc   :  { %v2832_v36 = vpop.f32.mrf.mxu0 }
 0x1fd   :  { %157 = vrot.lane.b32.xlu0 %v2832_v36, %s2732_s3 }
 0x201   :  { %325 = vrot.lane.b32.xlu0 %v2832_v36, %s2733_s16 }
 0x26f   :  { %v158_v37 = vpop.permute.xlu0 %157 }
 0x270   :  { %2483 = vmatpush3.xpose.msk.msra.mxu0 %vm159_vm2, %v158_v37 }
 0x271   :  { %2487 = vmatprep.subr.mxu0 %v2730_v34 }
 0x273   :  { %2485 = vmatmul.mubr.msk.f32.vlgmr.msra.gmra.mxu0 %vm159_vm2, %v2832_v36  ;;  %v326_v51 = vpop.permute.xlu0 %325 }
 0x274   :  { %2489 = vmatprep.mubr.msk.f32.mxu0 %vm2731_vm1, %v2730_v34 }
 0x333   :  { %v230_v38 = vpop.f32.mrf.mxu0 }
 0x334   :  { %v234_v39 = vmul.f32 0.35355338, %v230_v38 }
 0x335   :  { %v2486_v40 = vpop.f32.mrf.mxu0 }
 0x336   :  { %v235_v41 = vsel %vm159_vm2, %v234_v39, -inf }
 0x337   :  { %236 = vmax.xlane.f32.xlu1 %v235_v41 }
 0x348   :  { %246 = vrot.lane.b32.xlu1 %v2832_v36, %s2734_s17 }
 0x3c0   :  { %v237_v42 = vpop.xlane.xlu1 %236 }
 0x3c1   :  { %v238_v43 = vsub.f32 %v234_v39, %v237_v42 }
 0x3c3   :  { %v239_v44 = vmul.f32 1.442695, %v238_v43 }
 0x3c4   :  { %v247_v45 = vpop.permute.xlu1 %246 }
 0x3c5   :  { %2668 = vpow2.f32 %v239_v44  ;;  %2488 = vmatpush3.msra.mxu0 %v247_v45 }
 0x3c6   :  { %2492 = vmatprep.subr.mxu0 %v2730_v34 }
 0x3d2   :  { %v2669_v46 = vpop.eup %2668 }
 0x3d3   :  { %v241_v47 = vsel %vm159_vm2, %v2669_v46, 0.0 }
 0x3d4   :  { %242 = vadd.xlane.f32.xlu1 %v241_v47 }
 0x3e5   :  { %323 = vrot.lane.b32.xlu1 %v2832_v36, %s2735_s18 }
 0x45d   :  { %v243_v48 = vpop.xlane.xlu1 %242 }
 0x45e   :  { %2670 = vrcp.f32 %v243_v48 }
 0x461   :  { %v324_v52 = vpop.permute.xlu1 %323 }
 0x46b   :  { %v2671_v49 = vpop.eup %2670 }
 0x46c   :  { %v245_v50 = vmul.f32 %v2671_v49, %v2669_v46 }
 0x46e   :  { %2490 = vmatmul.mubr.msk.f32.vlgmr.msra.gmra.mxu0 %vm159_vm2, %v245_v50 }
 0x46f   :  { %2493 = vmatpush3.xpose.msk.msra.mxu0 %vm159_vm2, %v326_v51  ;;  %2494 = vmatprep.mubr.msk.f32.mxu0 %vm2731_vm1, %v2730_v34 }
 0x470   :  { %2497 = vmatprep.subr.mxu0 %v2730_v34 }
 0x472   :  { %2495 = vmatmul.mubr.msk.f32.vlgmr.msra.gmra.mxu0 %vm159_vm2, %v324_v52 }
 0x473   :  { %2499 = vmatprep.mubr.msk.f32.mxu0 %vm2731_vm1, %v2730_v34 }
 0x52e   :  { %v318_v54 = vpop.f32.mrf.mxu0 }
 0x52f   :  { %2510 = vmatmul.mubr.msk.f32.vlgmr.msra.gmra.mxu1 %vm159_vm2, %v318_v54 }
 0x530   :  { %v2491_v55 = vpop.f32.mrf.mxu0  ;;  %2519 = vmatprep.mubr.msk.f32.mxu1 %vm2731_vm1, %v2730_v34 }
 0x532   :  { %v397_v56 = vpop.f32.mrf.mxu0 }
 0x533   :  { %v401_v57 = vmul.f32 0.35355338, %v397_v56 }
 0x534   :  { %v2496_v58 = vpop.f32.mrf.mxu0 }
 0x535   :  { %v402_v59 = vsel %vm159_vm2, %v401_v57, -inf }
 0x536   :  { %403 = vmax.xlane.f32.xlu0 %v402_v59 }
 0x54c   :  { %413 = vrot.lane.b32.xlu0 %v2832_v36, %s2736_s21 }
 0x550   :  { %636 = vrot.lane.b32.xlu0 %v2832_v36, %s2737_s22 }
 0x5bf   :  { %v404_v60 = vpop.xlane.xlu0 %403 }
 0x5c0   :  { %v405_v61 = vsub.f32 %v401_v57, %v404_v60  ;;  %v2956_v57 = vld [vmem:[%s3130_s4 + $0x18] sm:$0xff] }
 0x5c2   :  { %v406_v62 = vmul.f32 1.442695, %v405_v61 }
 0x5c3   :  { %v414_v63 = vpop.permute.xlu0 %413 }
 0x5c4   :  { %2672 = vpow2.f32 %v406_v62  ;;  %2498 = vmatpush3.msra.mxu0 %v414_v63 }
 0x5c5   :  { %2502 = vmatprep.subr.mxu0 %v2730_v34 }
 0x5c7   :  { %v637_v13 = vpop.permute.xlu0 %636 }
 0x5d1   :  { %v2673_v2 = vpop.eup %2672 }
 0x5d2   :  { %v408_v3 = vsel %vm159_vm2, %v2673_v2, 0.0 }
 0x5d3   :  { %409 = vadd.xlane.f32.xlu1 %v408_v3 }
 0x5e4   :  { %638 = vrot.lane.b32.xlu1 %v2832_v36, %s2738_s23 }
 0x5ef   :  { %v2878_v4 = vpop.f32.mrf.mxu1 }
 0x5f1   :  { %v2511_v5 = vpop.f32.mrf.mxu1 }
 0x65c   :  { %v410_v6 = vpop.xlane.xlu1 %409 }
 0x65d   :  { %2674 = vrcp.f32 %v410_v6 }
 0x660   :  { %v639_v11 = vpop.permute.xlu1 %638 }
 0x66a   :  { %v2675_v7 = vpop.eup %2674 }
 0x66b   :  { %v412_v8 = vmul.f32 %v2675_v7, %v2673_v2 }
 0x66d   :  { %2500 = vmatmul.mubr.msk.f32.vlgmr.msra.gmra.mxu0 %vm159_vm2, %v412_v8 }
 0x66e   :  { %2503 = vmatpush3.msra.mxu0 %v2883_v9  ;;  %2504 = vmatprep.mubr.msk.f32.mxu0 %vm2731_vm1, %v2730_v34 }
 0x66f   :  { %2512 = vmatprep.subr.mxu0 %v2730_v34 }
 0x72d   :  { %v485_v10 = vpop.f32.mrf.mxu0 }
 0x72e   :  { %2505 = vmatmul.mubr.msk.f32.vlgmr.msra.gmra.mxu0 %vm159_vm2, %v485_v10 }
 0x72f   :  { %2513 = vmatpush3.xpose.msk.msra.mxu0 %vm159_vm2, %v639_v11  ;;  %v2501_v12 = vpop.f32.mrf.mxu0  ;;  %2514 = vmatprep.mubr.msk.f32.mxu0 %vm2731_vm1, %v2730_v34 }
 0x730   :  { %2522 = vmatprep.subr.mxu0 %v2730_v34 }
 0x732   :  { %2515 = vmatmul.mubr.msk.f32.vlgmr.msra.gmra.mxu0 %vm159_vm2, %v637_v13 }
 0x733   :  { %2524 = vmatprep.mubr.msk.f32.mxu0 %vm2731_vm1, %v2730_v34  ;;  %2523 = vmatpush3.msra.mxu0 %v2920_v31 }
 0x734   :  { %2532 = vmatprep.subr.mxu0 %v2730_v34 }
 0x7ee   :  { %v559_v14 = vpop.f32.mrf.mxu0 }
 0x7f0   :  { %v2506_v15 = vpop.f32.mrf.mxu0 }
 0x7f2   :  { %v710_v16 = vpop.f32.mrf.mxu0 }
 0x7f3   :  { %v714_v17 = vmul.f32 0.35355338, %v710_v16 }
 0x7f4   :  { %v2516_v18 = vpop.f32.mrf.mxu0 }
 0x7f5   :  { %v715_v19 = vsel %vm159_vm2, %v714_v17, -inf }
 0x7f6   :  { %716 = vmax.xlane.f32.xlu1 %v715_v19 }
 0x807   :  { %879 = vrot.lane.b32.xlu1 %v2832_v36, %s2739_s26 }
 0x80b   :  { %877 = vrot.lane.b32.xlu1 %v2832_v36, %s2740_s27 }
 0x80f   :  { %1119 = vrot.lane.b32.xlu1 %v2830_v35, %s2732_s3 }
 0x87f   :  { %v717_v20 = vpop.xlane.xlu1 %716 }
 0x880   :  { %v718_v21 = vsub.f32 %v714_v17, %v717_v20 }
 0x882   :  { %v719_v22 = vmul.f32 1.442695, %v718_v21 }
 0x883   :  { %v880_v28 = vpop.permute.xlu1 %879 }
 0x884   :  { %2676 = vpow2.f32 %v719_v22 }
 0x887   :  { %v878_v30 = vpop.permute.xlu1 %877 }
 0x88b   :  { %v1120_v50 = vpop.permute.xlu1 %1119 }
 0x891   :  { %v2677_v23 = vpop.eup %2676 }
 0x892   :  { %v721_v24 = vsel %vm159_vm2, %v2677_v23, 0.0 }
 0x893   :  { %722 = vadd.xlane.f32.xlu0 %v721_v24 }
 0x8a9   :  { %726 = vrot.lane.b32.xlu0 %v2832_v36, %s2741_s0 }
 0x91c   :  { %v723_v25 = vpop.xlane.xlu0 %722 }
 0x91d   :  { %2678 = vrcp.f32 %v723_v25 }
 0x920   :  { %v727_v26 = vpop.permute.xlu0 %726 }
 0x921   :  { %2518 = vmatpush3.msra.mxu1 %v727_v26 }
 0x922   :  { %2527 = vmatprep.subr.mxu1 %v2730_v34 }
 0x92a   :  { %v2679_v27 = vpop.eup %2678 }
 0x92b   :  { %v725_v29 = vmul.f32 %v2679_v27, %v2677_v23 }
 0x92d   :  { %2520 = vmatmul.mubr.msk.f32.vlgmr.msra.gmra.mxu1 %vm159_vm2, %v725_v29 }
 0x92e   :  { %2528 = vmatpush3.xpose.msk.msra.mxu1 %vm159_vm2, %v880_v28  ;;  %2529 = vmatprep.mubr.msk.f32.mxu1 %vm2731_vm1, %v2730_v34 }
 0x92f   :  { %2537 = vmatprep.subr.mxu1 %v2730_v34 }
 0x931   :  { %2530 = vmatmul.mubr.msk.f32.vlgmr.msra.gmra.mxu1 %vm159_vm2, %v878_v30 }
 0x932   :  { %2539 = vmatprep.mubr.msk.f32.mxu1 %vm2731_vm1, %v2730_v34  ;;  %2538 = vmatpush3.msra.mxu1 %v2956_v57 }
 0x933   :  { %2547 = vmatprep.subr.mxu1 %v2730_v34 }
 0x9ed   :  { %v798_v32 = vpop.f32.mrf.mxu1 }
 0x9ee   :  { %2525 = vmatmul.mubr.msk.f32.vlgmr.msra.gmra.mxu0 %vm159_vm2, %v798_v32 }
 0x9ef   :  { %v2521_v33 = vpop.f32.mrf.mxu1  ;;  %2534 = vmatprep.mubr.msk.f32.mxu0 %vm2731_vm1, %v2730_v34 }
 0x9f1   :  { %v951_v37 = vpop.f32.mrf.mxu1 }
 0x9f2   :  { %v955_v38 = vmul.f32 0.35355338, %v951_v37 }
 0x9f3   :  { %v2531_v39 = vpop.f32.mrf.mxu1 }
 0x9f4   :  { %v956_v40 = vsel %vm159_vm2, %v955_v38, -inf }
 0x9f5   :  { %957 = vmax.xlane.f32.xlu0 %v956_v40 }
 0xa0b   :  { %967 = vrot.lane.b32.xlu0 %v2832_v36, %s2742_s30  ;;  %v633_v36 = vadd.f32 %v2878_v4, %v559_v14 }
 0xa0f   :  { %1285 = vrot.lane.b32.xlu0 %v2830_v35, %s2733_s16 }
 0xa7e   :  { %v958_v41 = vpop.xlane.xlu0 %957 }
 0xa7f   :  { %v959_v42 = vsub.f32 %v955_v38, %v958_v41 }
 0xa81   :  { %v960_v43 = vmul.f32 1.442695, %v959_v42 }
 0xa82   :  { %v968_v44 = vpop.permute.xlu0 %967 }
 0xa83   :  { %2680 = vpow2.f32 %v960_v43  ;;  %2533 = vmatpush3.msra.mxu0 %v968_v44 }
 0xa84   :  { %2542 = vmatprep.subr.mxu0 %v2730_v34 }
 0xa86   :  { %v1286_v55 = vpop.permute.xlu0 %1285 }
 0xa90   :  { %v2681_v45 = vpop.eup %2680 }
 0xa91   :  { %v962_v46 = vsel %vm159_vm2, %v2681_v45, 0.0 }
 0xa92   :  { %963 = vadd.xlane.f32.xlu1 %v962_v46 }
 0xaa3   :  { %1283 = vrot.lane.b32.xlu1 %v2830_v35, %s2735_s18 }
 0xaae   :  { %v872_v47 = vpop.f32.mrf.mxu0 }
 0xaaf   :  { %v876_v48 = vadd.f32 %v872_v47, %v633_v36 }
 0xab0   :  { %v2526_v49 = vpop.f32.mrf.mxu0 }
 0xb1b   :  { %v964_v51 = vpop.xlane.xlu1 %963 }
 0xb1c   :  { %2682 = vrcp.f32 %v964_v51 }
 0xb1f   :  { %v1284_v56 = vpop.permute.xlu1 %1283 }
 0xb29   :  { %v2683_v52 = vpop.eup %2682 }
 0xb2a   :  { %v966_v54 = vmul.f32 %v2683_v52, %v2681_v45 }
 0xb2c   :  { %2535 = vmatmul.mubr.msk.f32.vlgmr.msra.gmra.mxu0 %vm159_vm2, %v966_v54 }
 0xb2d   :  { %2543 = vmatpush3.xpose.msk.msra.mxu0 %vm159_vm2, %v1120_v50  ;;  %2544 = vmatprep.mubr.msk.f32.mxu0 %vm2731_vm1, %v2730_v34 }
 0xb2e   :  { %2552 = vmatprep.subr.mxu0 %v2730_v34 }
 0xb30   :  { %2545 = vmatmul.mubr.msk.f32.vlgmr.msra.gmra.mxu0 %vm159_vm2, %v2830_v35 }
 0xb31   :  { %2553 = vmatpush3.xpose.msk.msra.mxu0 %vm159_vm2, %v1286_v55  ;;  %2554 = vmatprep.mubr.msk.f32.mxu0 %vm2731_vm1, %v2730_v34  ;;  %v2386_v55 = vld [vmem:[%s3127_s1 + $0x2] ss:$0 sm:$0xff] }
 0xb32   :  { %2562 = vmatprep.subr.mxu0 %v2730_v34 }
 0xb34   :  { %2555 = vmatmul.mubr.msk.f32.vlgmr.msra.gmra.mxu0 %vm159_vm2, %v1284_v56 }
 0xb35   :  { %2563 = vmatpush3.msra.mxu0 %v2883_v9  ;;  %2564 = vmatprep.mubr.msk.f32.mxu0 %vm2731_vm1, %v2730_v34 }
 0xb36   :  { %2572 = vmatprep.subr.mxu0 %v2730_v34 }
 0xbec   :  { %v1039_v58 = vpop.f32.mrf.mxu0 }
 0xbed   :  { %2540 = vmatmul.mubr.msk.f32.vlgmr.msra.gmra.mxu1 %vm159_vm2, %v1039_v58 }
 0xbee   :  { %v2536_v59 = vpop.f32.mrf.mxu0  ;;  %2549 = vmatprep.mubr.msk.f32.mxu1 %vm2731_vm1, %v2730_v34 }
 0xbf0   :  { %v1191_v60 = vpop.f32.mrf.mxu0 }
 0xbf1   :  { %v1195_v61 = vmul.f32 0.35355338, %v1191_v60 }
 0xbf2   :  { %v2546_v62 = vpop.f32.mrf.mxu0 }
 0xbf3   :  { %v1196_v63 = vsel %vm159_vm2, %v1195_v61, -inf }
 0xbf4   :  { %1197 = vmax.xlane.f32.xlu0 %v1196_v63  ;;  %v1357_v2 = vpop.f32.mrf.mxu0 }
 0xbf5   :  { %v1361_v3 = vmul.f32 0.35355338, %v1357_v2 }
 0xbf6   :  { %v2556_v4 = vpop.f32.mrf.mxu0 }
 0xbf7   :  { %v1362_v5 = vsel %vm159_vm2, %v1361_v3, -inf }
 0xbf8   :  { %1363 = vmax.xlane.f32.xlu1 %v1362_v5 }
 0xc09   :  { %1373 = vrot.lane.b32.xlu1 %v2830_v35, %s2736_s21 }
 0xc0d   :  { %1597 = vrot.lane.b32.xlu1 %v2830_v35, %s2738_s23 }
 0xc11   :  { %1595 = vrot.lane.b32.xlu1 %v2830_v35, %s2737_s22 }
 0xc7d   :  { %v1198_v6 = vpop.xlane.xlu0 %1197 }
 0xc7e   :  { %v1199_v7 = vsub.f32 %v1195_v61, %v1198_v6 }
 0xc80   :  { %v1200_v8 = vmul.f32 1.442695, %v1199_v7 }
 0xc81   :  { %v1364_v9 = vpop.xlane.xlu1 %1363 }
 0xc82   :  { %2684 = vpow2.f32 %v1200_v8  ;;  %v1365_v10 = vsub.f32 %v1361_v3, %v1364_v9 }
 0xc84   :  { %v1366_v11 = vmul.f32 1.442695, %v1365_v10 }
 0xc85   :  { %v1374_v24 = vpop.permute.xlu1 %1373 }
 0xc86   :  { %2686 = vpow2.f32 %v1366_v11 }
 0xc89   :  { %v1598_v28 = vpop.permute.xlu1 %1597 }
 0xc8f   :  { %v2685_v12 = vpop.eup %2684 }
 0xc90   :  { %v1202_v13 = vsel %vm159_vm2, %v2685_v12, 0.0 }
 0xc91   :  { %1203 = vadd.xlane.f32.xlu0 %v1202_v13 }
 0xc93   :  { %v2687_v14 = vpop.eup %2686 }
 0xc94   :  { %v1368_v15 = vsel %vm159_vm2, %v2687_v14, 0.0 }
 0xc95   :  { %1369 = vadd.xlane.f32.xlu0 %v1368_v15 }
 0xcab   :  { %1207 = vrot.lane.b32.xlu0 %v2830_v35, %s2734_s17 }
 0xcad   :  { %v1113_v16 = vpop.f32.mrf.mxu1 }
 0xcae   :  { %v2975_v17 = vadd.f32 %v1113_v16, %v876_v48 }
 0xcaf   :  { %v2541_v18 = vpop.f32.mrf.mxu1 }
 0xcb0   :  { %v2080_v59 = vadd.f32 %v2386_v55, %v2975_v17 }
 0xd1a   :  { %v1204_v19 = vpop.xlane.xlu0 %1203 }
 0xd1b   :  { %2688 = vrcp.f32 %v1204_v19 }
 0xd1e   :  { %v1370_v20 = vpop.xlane.xlu0 %1369 }
 0xd1f   :  { %2690 = vrcp.f32 %v1370_v20 }
 0xd22   :  { %v1208_v21 = vpop.permute.xlu0 %1207 }
 0xd23   :  { %2548 = vmatpush3.msra.mxu1 %v1208_v21 }
 0xd24   :  { %2557 = vmatprep.subr.mxu1 %v2730_v34 }
 0xd28   :  { %v2689_v22 = vpop.eup %2688 }
 0xd29   :  { %v1206_v23 = vmul.f32 %v2689_v22, %v2685_v12 }
 0xd2b   :  { %2550 = vmatmul.mubr.msk.f32.vlgmr.msra.gmra.mxu1 %vm159_vm2, %v1206_v23 }
 0xd2c   :  { %v2691_v25 = vpop.eup %2690  ;;  %2558 = vmatpush3.msra.mxu1 %v1374_v24  ;;  %2559 = vmatprep.mubr.msk.f32.mxu1 %vm2731_vm1, %v2730_v34 }
 0xd2d   :  { %v1372_v26 = vmul.f32 %v2691_v25, %v2687_v14  ;;  %2567 = vmatprep.subr.mxu1 %v2730_v34 }
 0xd2f   :  { %2560 = vmatmul.mubr.msk.f32.vlgmr.msra.gmra.mxu1 %vm159_vm2, %v1372_v26 }
 0xd30   :  { %2568 = vmatpush3.msra.mxu1 %v2862_v53  ;;  %2569 = vmatprep.mubr.msk.f32.mxu1 %vm2731_vm1, %v2730_v34  ;;  %v1596_v53 = vpop.permute.xlu1 %1595 }
 0xd31   :  { %2577 = vmatprep.subr.mxu1 %v2730_v34 }
 0xdeb   :  { %v1279_v27 = vpop.f32.mrf.mxu1 }
 0xdec   :  { %2570 = vmatmul.mubr.msk.f32.vlgmr.msra.gmra.mxu1 %vm159_vm2, %v1279_v27 }
 0xded   :  { %v2551_v29 = vpop.f32.mrf.mxu1  ;;  %2579 = vmatprep.mubr.msk.f32.mxu1 %vm2731_vm1, %v2730_v34 }
 0xdef   :  { %v1445_v30 = vpop.f32.mrf.mxu1 }
 0xdf0   :  { %2565 = vmatmul.mubr.msk.f32.vlgmr.msra.gmra.mxu0 %vm159_vm2, %v1445_v30 }
 0xdf1   :  { %2573 = vmatpush3.xpose.msk.msra.mxu0 %vm159_vm2, %v1598_v28  ;;  %v2561_v32 = vpop.f32.mrf.mxu1  ;;  %2574 = vmatprep.mubr.msk.f32.mxu0 %vm2731_vm1, %v2730_v34 }
 0xdf2   :  { %2582 = vmatprep.subr.mxu0 %v2730_v34 }
 0xdf4   :  { %2575 = vmatmul.mubr.msk.f32.vlgmr.msra.gmra.mxu0 %vm159_vm2, %v1596_v53 }
 0xdf5   :  { %2583 = vmatpush3.msra.mxu0 %v2920_v31  ;;  %2584 = vmatprep.mubr.msk.f32.mxu0 %vm2731_vm1, %v2730_v34 }
 0xdf6   :  { %2592 = vmatprep.subr.mxu0 %v2730_v34 }
 0xeac   :  { %v1591_v33 = vpop.f32.mrf.mxu1 }
 0xeae   :  { %v2571_v37 = vpop.f32.mrf.mxu1 }
 0xeb0   :  { %v1518_v38 = vpop.f32.mrf.mxu0 }
 0xeb1   :  { %v1592_v39 = vadd.f32 %v1591_v33, %v1518_v38  ;;  %v2387_v33 = vld [vmem:[%s3127_s1 + $0x3] ss:$0 sm:$0xff]  ;;  %v2388_v38 = vld [vmem:[%s3127_s1 + $0x4] ss:$0 sm:$0xff] }
 0xeb2   :  { %v2566_v40 = vpop.f32.mrf.mxu0 }
 0xeb4   :  { %v1669_v41 = vpop.f32.mrf.mxu0 }
 0xeb5   :  { %v1673_v42 = vmul.f32 0.35355338, %v1669_v41  ;;  %v2127_v41 = vld [vmem:[%s3131_s5 + $0x18] sm:$0xff] }
 0xeb6   :  { %v2576_v43 = vpop.f32.mrf.mxu0 }
 0xeb7   :  { %v1674_v44 = vsel %vm159_vm2, %v1673_v42, -inf  ;;  %v2125_v43 = vld [vmem:[%s3131_s5 + $0x8] sm:$0xff] }
 0xeb8   :  { %1675 = vmax.xlane.f32.xlu0 %v1674_v44  ;;  %v2124_v44 = vld [vmem:[%s3131_s5] sm:$0xff] }
 0xece   :  { %1685 = vrot.lane.b32.xlu0 %v2830_v35, %s2741_s0  ;;  %s2743_s0 = smov [#allocation2]  }
 0xecf   :  { %s2339_s28 = sshll.u32 %s2743_s0, 4  ;;  %s2340_s28 = int_to_ptr.vmem [resolvable:$true] %s2339_s28 }
 0xed0   :  { %s2708_s29 = scalar_lea.vmem %s2340_s28, 256  ;;  %p2713_p1 = scmp.lt.s32.totalorder %s2340_s28, %s2340_s28 }
 0xed1   :  { %p2709_p0 = scmp.ne.s32.totalorder %s2340_s28, %s2708_s29  ;;  %p2714_p2 = scmp.lt.s32.totalorder %s2708_s29, %s2708_s29 }
 0xed2   :  { %1835 = vrot.lane.b32.xlu0 %v2830_v35, %s2740_s27 }
 0xed3   :  { %p2715_p3 = por %p2714_p2, %p2713_p1 }
 0xed5   :  { %p2716_p4 = pnand %p2715_p3, %p2709_p0 }
 0xf41   :  { %v1676_v31 = vpop.xlane.xlu0 %1675 }
 0xf42   :  { %v1677_v45 = vsub.f32 %v1673_v42, %v1676_v31  ;;  %v2126_v42 = vld [vmem:[%s3131_s5 + $0x10] sm:$0xff] }
 0xf44   :  { %v1678_v46 = vmul.f32 1.442695, %v1677_v45 }
 0xf45   :  { %v1686_v36 = vpop.permute.xlu0 %1685 }
 0xf46   :  { %2692 = vpow2.f32 %v1678_v46  ;;  %2578 = vmatpush3.msra.mxu1 %v1686_v36 }
 0xf47   :  { %2587 = vmatprep.subr.mxu1 %v2730_v34 }
 0xf49   :  { %v1836_v54 = vpop.permute.xlu0 %1835 }
 0xf53   :  { %v2693_v47 = vpop.eup %2692 }
 0xf54   :  { %v1680_v48 = vsel %vm159_vm2, %v2693_v47, 0.0 }
 0xf55   :  { %1681 = vadd.xlane.f32.xlu1 %v1680_v48 }
 0xf66   :  { %1837 = vrot.lane.b32.xlu1 %v2830_v35, %s2739_s26 }
 0xfde   :  { %v1682_v49 = vpop.xlane.xlu1 %1681 }
 0xfdf   :  { %2694 = vrcp.f32 %v1682_v49 }
 0xfe2   :  { %v1838_v52 = vpop.permute.xlu1 %1837 }
 0xfec   :  { %v2695_v50 = vpop.eup %2694 }
 0xfed   :  { %v1684_v51 = vmul.f32 %v2695_v50, %v2693_v47  ;;  %v2249_v50 = vld [vmem:[%s3132_s6 + $0x78] sm:$0xff] }
 0xfef   :  { %2580 = vmatmul.mubr.msk.f32.vlgmr.msra.gmra.mxu1 %vm159_vm2, %v1684_v51  ;;  %v2248_v51 = vld [vmem:[%s3132_s6 + $0x70] sm:$0xff] }
 0xff0   :  { %2588 = vmatpush3.xpose.msk.msra.mxu1 %vm159_vm2, %v1838_v52  ;;  %2589 = vmatprep.mubr.msk.f32.mxu1 %vm2731_vm1, %v2730_v34  ;;  %v2247_v52 = vld [vmem:[%s3132_s6 + $0x68] sm:$0xff] }
 0xff1   :  { %2597 = vmatprep.subr.mxu1 %v2730_v34 }
 0xff3   :  { %2590 = vmatmul.mubr.msk.f32.vlgmr.msra.gmra.mxu1 %vm159_vm2, %v1836_v54  ;;  %v2246_v54 = vld [vmem:[%s3132_s6 + $0x60] sm:$0xff] }
 0xff4   :  { %2598 = vmatpush3.msra.mxu1 %v2956_v57  ;;  %2599 = vmatprep.mubr.msk.f32.mxu1 %vm2731_vm1, %v2730_v34  ;;  %v3026_v57 = vadd.f32 %v2080_v59, %v2789_v0  ;;  %v2242_v59 = vld [vmem:[%s3132_s6 + $0x40] sm:$0xff] }
 0xff5   :  { %2613 = vmatprep.subr.mxu1 %v2249_v50 }
 0xff6   :  { %v2086_v2 = vsel %vm31_vm0, %v3026_v57, 0.0 }
0x10af   :  { %v1757_v56 = vpop.f32.mrf.mxu1 }
0x10b0   :  { %2585 = vmatmul.mubr.msk.f32.vlgmr.msra.gmra.mxu0 %vm159_vm2, %v1757_v56  ;;  %v2244_v56 = vld [vmem:[%s3132_s6 + $0x50] sm:$0xff] }
0x10b1   :  { %v2581_v58 = vpop.f32.mrf.mxu1  ;;  %2594 = vmatprep.mubr.msk.f32.mxu0 %vm2731_vm1, %v2730_v34 }
0x10b2   :  { %v2243_v58 = vld [vmem:[%s3132_s6 + $0x48] sm:$0xff] }
0x10b3   :  { %v1909_v60 = vpop.f32.mrf.mxu1 }
0x10b4   :  { %v1913_v61 = vmul.f32 0.35355338, %v1909_v60  ;;  %v2241_v60 = vld [vmem:[%s3132_s6 + $0x38] sm:$0xff] }
0x10b5   :  { %v2591_v62 = vpop.f32.mrf.mxu1 }
0x10b6   :  { %v1914_v63 = vsel %vm159_vm2, %v1913_v61, -inf  ;;  %v2239_v62 = vld [vmem:[%s3132_s6 + $0x28] sm:$0xff] }
0x10b7   :  { %1915 = vmax.xlane.f32.xlu1 %v1914_v63  ;;  %v2238_v63 = vld [vmem:[%s3132_s6 + $0x20] sm:$0xff] }
0x10bb   :  { %2087 = vadd.xlane.f32.xlu1 %v2086_v2  ;;  %v2237_v2 = vld [vmem:[%s3132_s6 + $0x18] sm:$0xff] }
0x1140   :  { %v1916_v3 = vpop.xlane.xlu1 %1915 }
0x1141   :  { %v1917_v4 = vsub.f32 %v1913_v61, %v1916_v3  ;;  %v2240_v61 = vld [vmem:[%s3132_s6 + $0x30] sm:$0xff] }
0x1142   :  { %v2236_v3 = vld [vmem:[%s3132_s6 + $0x10] sm:$0xff] }
0x1143   :  { %v1918_v5 = vmul.f32 1.442695, %v1917_v4  ;;  %v2235_v4 = vld [vmem:[%s3132_s6 + $0x8] sm:$0xff] }
0x1144   :  { %v2088_v15 = vpop.xlane.xlu1 %2087 }
0x1145   :  { %2696 = vpow2.f32 %v1918_v5  ;;  %v2092_v16 = vmul.f32 0.03125, %v2088_v15  ;;  %v2234_v5 = vld [vmem:[%s3132_s6] sm:$0xff] }
0x1147   :  { %v2094_v19 = vsub.f32 %v3026_v57, %v2092_v16 }
0x1149   :  { %v2096_v23 = vmul.f32 %v2094_v19, %v2094_v19 }
0x114b   :  { %v2098_v24 = vsel %vm31_vm0, %v2096_v23, 0.0 }
0x1152   :  { %v2697_v34 = vpop.eup %2696 }
0x1153   :  { %v1920_v6 = vsel %vm159_vm2, %v2697_v34, 0.0 }
0x1154   :  { %1921 = vadd.xlane.f32.xlu0 %v1920_v6 }
0x116a   :  { %1925 = vrot.lane.b32.xlu0 %v2830_v35, %s2742_s30 }
0x1170   :  { %v1830_v0 = vpop.f32.mrf.mxu0 }
0x1171   :  { %v1834_v7 = vadd.f32 %v1830_v0, %v1592_v39 }
0x1172   :  { %v2586_v8 = vpop.f32.mrf.mxu0 }
0x11dd   :  { %v1922_v9 = vpop.xlane.xlu0 %1921 }
0x11de   :  { %2698 = vrcp.f32 %v1922_v9 }
0x11e1   :  { %v1926_v10 = vpop.permute.xlu0 %1925 }
0x11e2   :  { %2593 = vmatpush3.msra.mxu0 %v1926_v10 }
0x11e3   :  { %2602 = vmatprep.subr.mxu0 %v2127_v41 }
0x11eb   :  { %v2699_v11 = vpop.eup %2698 }
0x11ec   :  { %v1924_v12 = vmul.f32 %v2699_v11, %v2697_v34  ;;  %v2389_v34 = vld [vmem:[%s3128_s2] ss:$0 sm:$0xff] }
0x11ee   :  { %2595 = vmatmul.mubr.msk.f32.vlgmr.msra.gmra.mxu0 %vm159_vm2, %v1924_v12 }
0x11ef   :  { %2603 = vmatpush3.msra.mxu0 %v2127_v41 }
0x11f0   :  { %2604 = vmatprep.subr.mxu0 %v2126_v42 }
0x11f1   :  { %2605 = vmatpush3.msra.mxu0 %v2126_v42 }
0x11f2   :  { %2606 = vmatprep.subr.mxu0 %v2125_v43 }
0x11f3   :  { %2607 = vmatpush3.msra.mxu0 %v2125_v43 }
0x11f4   :  { %2608 = vmatprep.subr.mxu0 %v2124_v44 }
0x11f5   :  { %2609 = vmatpush3.msra.mxu0 %v2124_v44 }
0x12ae   :  { %v1997_v13 = vpop.f32.mrf.mxu0 }
0x12af   :  { %2600 = vmatmul.mubr.msk.f32.vlgmr.msra.gmra.mxu1 %vm159_vm2, %v1997_v13 }
0x12b0   :  { %v2596_v14 = vpop.f32.mrf.mxu0  ;;  %2614 = vmatpush3.msra.mxu1 %v2249_v50 }
0x12b1   :  { %2615 = vmatprep.subr.mxu1 %v2248_v51 }
0x12b2   :  { %2616 = vmatpush3.msra.mxu1 %v2248_v51 }
0x12b3   :  { %2617 = vmatprep.subr.mxu1 %v2247_v52 }
0x12b4   :  { %2618 = vmatpush3.msra.mxu1 %v2247_v52 }
0x12b5   :  { %2619 = vmatprep.subr.mxu1 %v2246_v54 }
0x12b6   :  { %2620 = vmatpush3.msra.mxu1 %v2246_v54 }
0x136f   :  { %v2070_v17 = vpop.f32.mrf.mxu1 }
0x1370   :  { %v2074_v18 = vadd.f32 %v2070_v17, %v1834_v7 }
0x1371   :  { %v2601_v35 = vpop.f32.mrf.mxu1 }
0x1372   :  { %v2081_v20 = vadd.f32 %v2386_v55, %v2074_v18  ;;  %v2245_v55 = vld [vmem:[%s3132_s6 + $0x58] sm:$0xff] }
0x1373   :  { %2621 = vmatprep.subr.mxu1 %v2245_v55 }
0x1374   :  { %v3038_v21 = vadd.f32 %v2081_v20, %v2794_v1  ;;  %2622 = vmatpush3.msra.mxu1 %v2245_v55 }
0x1375   :  { %2623 = vmatprep.subr.mxu1 %v2244_v56 }
0x1376   :  { %v2089_v22 = vsel %vm31_vm0, %v3038_v21, 0.0  ;;  %2624 = vmatpush3.msra.mxu1 %v2244_v56 }
0x1377   :  { %2090 = vadd.xlane.f32.xlu1 %v2089_v22  ;;  %2625 = vmatprep.subr.mxu1 %v2243_v58 }
0x1378   :  { %2626 = vmatpush3.msra.mxu1 %v2243_v58 }
0x1379   :  { %2627 = vmatprep.subr.mxu1 %v2242_v59 }
0x137a   :  { %2628 = vmatpush3.msra.mxu1 %v2242_v59 }
0x137b   :  { %2099 = vadd.xlane.f32.xlu1 %v2098_v24  ;;  %2629 = vmatprep.subr.mxu1 %v2241_v60 }
0x137c   :  { %2630 = vmatpush3.msra.mxu1 %v2241_v60 }
0x137d   :  { %2631 = vmatprep.subr.mxu1 %v2240_v61 }
0x137e   :  { %2632 = vmatpush3.msra.mxu1 %v2240_v61 }
0x137f   :  { %2633 = vmatprep.subr.mxu1 %v2239_v62 }
0x1380   :  { %2634 = vmatpush3.msra.mxu1 %v2239_v62 }
0x1381   :  { %2635 = vmatprep.subr.mxu1 %v2238_v63 }
0x1382   :  { %2636 = vmatpush3.msra.mxu1 %v2238_v63 }
0x1383   :  { %2637 = vmatprep.subr.mxu1 %v2237_v2 }
0x1384   :  { %2638 = vmatpush3.msra.mxu1 %v2237_v2 }
0x1385   :  { %2639 = vmatprep.subr.mxu1 %v2236_v3 }
0x1386   :  { %2640 = vmatpush3.msra.mxu1 %v2236_v3 }
0x1387   :  { %2641 = vmatprep.subr.mxu1 %v2235_v4 }
0x1388   :  { %2642 = vmatpush3.msra.mxu1 %v2235_v4 }
0x1389   :  { %2643 = vmatprep.subr.mxu1 %v2234_v5 }
0x138a   :  { %2644 = vmatpush3.msra.mxu1 %v2234_v5 }
0x1400   :  { %v2091_v25 = vpop.xlane.xlu1 %2090 }
0x1401   :  { %v2093_v26 = vmul.f32 0.03125, %v2091_v25 }
0x1403   :  { %v2095_v27 = vsub.f32 %v3038_v21, %v2093_v26 }
0x1404   :  { %v2100_v28 = vpop.xlane.xlu1 %2099 }
0x1405   :  { %v2104_v29 = vmul.f32 0.03125, %v2100_v28  ;;  %v2097_v30 = vmul.f32 %v2095_v27, %v2095_v27 }
0x1407   :  { %v2106_v32 = vadd.f32 1e-05, %v2104_v29  ;;  %v2101_v53 = vsel %vm31_vm0, %v2097_v30, 0.0 }
0x1408   :  { %2102 = vadd.xlane.f32.xlu1 %v2101_v53 }
0x1409   :  { %2700 = vrsqrt.f32 %v2106_v32 }
0x1416   :  { %v2701_v1 = vpop.eup %2700 }
0x1417   :  { %v2110_v37 = vmul.f32 %v2701_v1, %v2094_v19 }
0x1419   :  { %v2116_v39 = vmul.f32 %v2387_v33, %v2110_v37 }
0x141b   :  { %v2122_v40 = vadd.f32 %v2388_v38, %v2116_v39 }
0x141d   :  { %2610 = vmatprep.mubr.msk.f32.mxu0 %vm31_vm0, %v2122_v40 }
0x1491   :  { %v2103_v31 = vpop.xlane.xlu1 %2102 }
0x1492   :  { %v2105_v45 = vmul.f32 0.03125, %v2103_v31 }
0x1494   :  { %v2107_v46 = vadd.f32 1e-05, %v2105_v45 }
0x1496   :  { %2702 = vrsqrt.f32 %v2107_v46 }
0x14a3   :  { %v2703_v36 = vpop.eup %2702 }
0x14a4   :  { %v2111_v47 = vmul.f32 %v2703_v36, %v2095_v27  ;;  %v2392_v27 = vld [vmem:[%s3127_s1 + $0x5] ss:$0 sm:$0xff] }
0x14a6   :  { %v2117_v48 = vmul.f32 %v2387_v33, %v2111_v47 }
0x14a8   :  { %v2123_v49 = vadd.f32 %v2388_v38, %v2117_v48 }
0x14aa   :  { %2611 = vmatmul.mubr.msk.f32.vlgmr.msra.gmra.mxu0 %vm31_vm0, %v2123_v49 }
0x156a   :  { %v2612_v6 = vpop.f32.mrf.mxu0 }
0x156b   :  { %v2213_v0 = vadd.f32 %v2612_v6, %v2389_v34 }
0x156c   :  { %v2207_v7 = vpop.f32.mrf.mxu0 }
0x156d   :  { %v2219_v8 = vmul.f32 %v2213_v0, %v2213_v0  ;;  %v2208_v9 = vadd.f32 %v2389_v34, %v2207_v7  ;;  %v2217_v24 = vmul.f32 0.5, %v2213_v0 }
0x156f   :  { %v2221_v10 = vmul.f32 %v2219_v8, %v2213_v0  ;;  %v2218_v11 = vmul.f32 %v2208_v9, %v2208_v9  ;;  %v2216_v22 = vmul.f32 0.5, %v2208_v9 }
0x1571   :  { %v2223_v12 = vmul.f32 0.044715, %v2221_v10  ;;  %v2220_v13 = vmul.f32 %v2218_v11, %v2208_v9 }
0x1573   :  { %v2225_v14 = vadd.f32 %v2223_v12, %v2213_v0  ;;  %v2222_v15 = vmul.f32 0.044715, %v2220_v13 }
0x1575   :  { %v2227_v16 = vmul.f32 0.7978845, %v2225_v14  ;;  %v2224_v17 = vadd.f32 %v2222_v15, %v2208_v9 }
0x1577   :  { %2704 = vtanh.f32 %v2227_v16  ;;  %v2226_v18 = vmul.f32 0.7978845, %v2224_v17 }
0x1579   :  { %2706 = vtanh.f32 %v2226_v18 }
0x1584   :  { %v2705_v35 = vpop.eup %2704 }
0x1585   :  { %v2231_v20 = vadd.f32 1.0, %v2705_v35 }
0x1586   :  { %v2707_v19 = vpop.eup %2706 }
0x1587   :  { %v2230_v23 = vadd.f32 1.0, %v2707_v19  ;;  %v2233_v26 = vmul.f32 %v2231_v20, %v2217_v24 }
0x1589   :  { %v2232_v25 = vmul.f32 %v2230_v23, %v2216_v22 }
0x158b   :  { %2645 = vmatprep.mubr.f32.mxu1 %v2232_v25 }
0x158c   :  { %2646 = vmatmul.mubr.f32.vlgmr.msra.gmra.mxu1 %v2233_v26 }
0x164c   :  { %v2647_v28 = vpop.f32.mrf.mxu1 }
0x164d   :  { %v2327_v29 = vadd.f32 %v2647_v28, %v2392_v27 }
0x164e   :  { %v2321_v30 = vpop.f32.mrf.mxu1 }
0x164f   :  { %v2331_v32 = vadd.f32 %v2327_v29, %v3038_v21  ;;  %v2322_v53 = vadd.f32 %v2392_v27, %v2321_v30 }
0x1651   :  { %2333 = vst.msk [vmem:[#allocation2 + $0x8] sm:$0xff] %vm31_vm0, %v2331_v32  ;;  %v2330_v1 = vadd.f32 %v2322_v53, %v3026_v57 }
0x1653   :  { %2332 = vst.msk [vmem:[#allocation2] sm:$0xff] %vm31_vm0, %v2330_v1 }
0x1654   :  { %2719 = shalt.err (!%p2716_p4)
}
0x1655   :  { %s2744_s1 = smov 128   ;;  %s2745_s30 = smov 8  }
0x1656   :  { %2345 = dma.vmem_to_hbm [thread:$0]  %s2340_s28, 256, %s3133_s7, [#allocation3], %s2744_s1, %s2744_s1, %s2745_s30  }
0x1657   :  { %2728 = dma.done.wait [#allocation3], 256  }
0x1658   :  { %2729 = vsyncadd [#allocation3], 4294967040 }
0x1659   :  { %2349 = vsyncpa [#allocation3], 1 }

</bundles_post_ra>
